<compile_context>
chip_gen: v6e
topology: v6e:2x2x1
jax: 0.10.0
libtpu: 0.0.40
codegen_flags: <defaults>
</compile_context>

<pallas_src>
import jax
import jax.numpy as jnp
from jax import lax
from jax.experimental import pallas as pl
from jax.experimental.pallas import tpu as pltpu

LN_EPS = 1e-5


def ff_kernel(x_ref, w1_ref, b1_ref, w2e_ref, b2e_ref, gamma_ref, beta_ref,
              avg_ref, o_ref):
    ow = o_ref.shape[-1]
    # ---- layer 0: WNLinear -> Dropout(identity, eval) -> ReLU ----
    x = x_ref[...].astype(jnp.bfloat16)           # cast in-kernel (no HBM pass)
    h = jnp.dot(x, w1_ref[...], preferred_element_type=jnp.float32)
    h = jnp.maximum(h + b1_ref[...], 0.0)
    # ---- layer 1 (last): WNLinear -> Dropout(identity) -> Identity -> LayerNorm
    # One bf16 K=256 matmul produces [y | group-mean(y)] (mean folded into W2).
    ye = jnp.dot(h.astype(jnp.bfloat16), w2e_ref[...],
                 preferred_element_type=jnp.float32)
    ye = ye + b2e_ref[...]
    c = ye[:, :ow] - ye[:, ow:]                   # y - mean (lane-aligned slices)
    # Variance via bf16 block-diag averaging matmul (c*c >= 0, rel err ~2^-8).
    cc = (c * c).astype(jnp.bfloat16)
    var = jnp.dot(cc, avg_ref[...], preferred_element_type=jnp.float32)
    # LN tail: one rsqrt (EUP), then scale-mul + FMA per element.
    scale = gamma_ref[...] * lax.rsqrt(var + LN_EPS)
    o_ref[...] = (c * scale + beta_ref[...]).astype(o_ref.dtype)


def prepare_feedforward_params(w1, b1, w2, b2, gamma, beta):
    """Host-side weight preprocessing. Call once per weight set.

    w1: [dim, hidden], w2: [hidden, dim] (effective weight-normed, [in, out])."""
    D, Hd = w1.shape
    assert 128 % D == 0, "dim must divide 128 for lane packing"
    P = 128 // D                 # tokens packed per 128-lane row
    OW, HW = P * D, P * Hd
    eyeP = jnp.eye(P, dtype=jnp.float32)
    avg_f32 = jnp.kron(eyeP, jnp.full((D, D), 1.0 / D, dtype=jnp.float32))  # [OW,OW]
    w1_bd = jnp.kron(eyeP, w1.astype(jnp.float32)).astype(jnp.bfloat16)     # [OW,HW]
    w2_bd = jnp.kron(eyeP, w2.astype(jnp.float32))                          # [HW,OW] f32
    w2_ext = jnp.concatenate([w2_bd, w2_bd @ avg_f32], axis=1).astype(jnp.bfloat16)
    b1_bd = jnp.tile(b1.reshape(-1).astype(jnp.float32), P).reshape(1, HW)
    b2_bd = jnp.tile(b2.reshape(-1).astype(jnp.float32), P).reshape(1, OW)
    b2_ext = jnp.concatenate([b2_bd, b2_bd @ avg_f32], axis=1)              # [1,2*OW]
    g_bd = jnp.tile(gamma.reshape(-1).astype(jnp.float32), P).reshape(1, OW)
    be_bd = jnp.tile(beta.reshape(-1).astype(jnp.float32), P).reshape(1, OW)
    avg_bf16 = avg_f32.astype(jnp.bfloat16)       # 1/32 exact in bf16
    return dict(dim=D, w1=w1_bd, b1=b1_bd, w2e=w2_ext, b2e=b2_ext,
                gamma=g_bd, beta=be_bd, avg=avg_bf16)


def _choose_tiling(rows, block_rows):
    """Pick (block_rows, grid, padded_rows): grid >= 2 (v7x megacore), block
    multiple of 8, and prefer an exact split so no pad/slice HBM pass."""
    g_min = max(2, -(-rows // block_rows))
    if rows % 8 == 0:
        for g in range(g_min, g_min + 64):
            if rows % g == 0 and (rows // g) % 8 == 0:
                return rows // g, g, rows           # exact: no padding
    g = g_min
    br = max(8, -(-rows // (g * 8)) * 8)
    return br, g, g * br


def feedforward_pallas(x, params, *, block_rows=1024, out_dtype=jnp.bfloat16):
    """x: [B, H, W, dim] channels-last, any float dtype (cast in-kernel).
    params: output of prepare_feedforward_params. Returns [B, H, W, dim]."""
    B, H, W, D = x.shape
    assert D == params["dim"]
    P = 128 // D
    OW = P * D

    N = B * H * W
    rows = -(-N // P)
    br, grid, padded_rows = _choose_tiling(rows, block_rows)
    pad_tokens = padded_rows * P - N

    x2 = x.reshape(N, D)
    if pad_tokens:
        x2 = jnp.pad(x2, ((0, pad_tokens), (0, 0)))
    # Free repack: row-major [padded_rows*P, D] is bit-identical to [padded_rows, P*D].
    xp = x2.reshape(padded_rows, OW)

    out = pl.pallas_call(
        ff_kernel,
        out_shape=jax.ShapeDtypeStruct((padded_rows, OW), out_dtype),
        grid_spec=pltpu.PrefetchScalarGridSpec(
            num_scalar_prefetch=0,
            grid=(grid,),
            in_specs=[
                pl.BlockSpec((br, OW), lambda i: (i, 0)),            # x tile (native dtype)
                pl.BlockSpec(params["w1"].shape, lambda i: (0, 0)),  # W1 block-diag (bf16)
                pl.BlockSpec(params["b1"].shape, lambda i: (0, 0)),  # b1 tiled (f32)
                pl.BlockSpec(params["w2e"].shape, lambda i: (0, 0)), # [W2 | W2@avg] (bf16)
                pl.BlockSpec(params["b2e"].shape, lambda i: (0, 0)), # [b2 | b2@avg] (f32)
                pl.BlockSpec(params["gamma"].shape, lambda i: (0, 0)),
                pl.BlockSpec(params["beta"].shape, lambda i: (0, 0)),
                pl.BlockSpec(params["avg"].shape, lambda i: (0, 0)), # averaging (bf16)
            ],
            out_specs=pl.BlockSpec((br, OW), lambda i: (i, 0)),
        ),
        compiler_params=pltpu.CompilerParams(
            dimension_semantics=("parallel",),
        ),
    )(xp, params["w1"], params["b1"], params["w2e"], params["b2e"],
      params["gamma"], params["beta"], params["avg"])

    out2 = out.reshape(padded_rows * P, D)
    if pad_tokens:
        out2 = out2[:N]
    return out2.reshape(B, H, W, D)


def weight_norm_effective(v, g):
    """PyTorch weight_norm (dim=0): W[o,:] = g[o] * v[o,:] / ||v[o,:]||."""
    norm = jnp.sqrt(jnp.sum(v * v, axis=1, keepdims=True))
    return g[:, None] * v / norm


def feedforward_reference(x, w1, b1, w2, b2, gamma, beta):
    h = jnp.maximum(x @ w1 + b1, 0.0)
    y = h @ w2 + b2
    mean = jnp.mean(y, axis=-1, keepdims=True)
    var = jnp.mean((y - mean) ** 2, axis=-1, keepdims=True)
    return (y - mean) / jnp.sqrt(var + LN_EPS) * gamma + beta


if __name__ == "__main__":
    # Module config: dim=32, factor=2, ff_weight_norm=True, n_layers=2,
    # layer_norm=True, dropout=0.0 (eval -> dropout is identity).
    dim, factor = 32, 2
    hidden = dim * factor
    B, Hs, Ws = 2, 16, 16

    key = jax.random.PRNGKey(0)
    ks = jax.random.split(key, 8)

    x = jax.random.normal(ks[0], (B, Hs, Ws, dim), dtype=jnp.float32)

    # WNLinear parameters (v, g, b) per layer; effective weights built in glue.
    v1 = jax.random.normal(ks[1], (hidden, dim), dtype=jnp.float32) * 0.1
    g1 = jax.random.uniform(ks[2], (hidden,), minval=0.5, maxval=1.5)
    b1 = jax.random.normal(ks[3], (hidden,), dtype=jnp.float32) * 0.05
    v2 = jax.random.normal(ks[4], (dim, hidden), dtype=jnp.float32) * 0.1
    g2 = jax.random.uniform(ks[5], (dim,), minval=0.5, maxval=1.5)
    b2 = jax.random.normal(ks[6], (dim,), dtype=jnp.float32) * 0.05
    # LayerNorm affine params (PyTorch default init: ones / zeros).
    gamma = jnp.ones((dim,), dtype=jnp.float32)
    beta = jnp.zeros((dim,), dtype=jnp.float32)

    # Effective weight-normed weights, transposed to [in, out].
    w1_eff = weight_norm_effective(v1, g1).T          # [dim, hidden]
    w2_eff = weight_norm_effective(v2, g2).T          # [hidden, dim]

    # One-time weight preprocessing (amortized across forward calls).
    params = prepare_feedforward_params(w1_eff, b1, w2_eff, b2, gamma, beta)
    params = jax.tree_util.tree_map(
        lambda a: jax.block_until_ready(a) if isinstance(a, jax.Array) else a, params)

    out = feedforward_pallas(x, params)
    out = jax.block_until_ready(out)

    # Reference with matched bf16 quantization of x and the matmul weights
    # (kernel keeps accumulation + LayerNorm statistics in f32 / bf16 stats).
    f32 = jnp.float32
    x_q = x.astype(jnp.bfloat16).astype(f32)
    w1_q = w1_eff.astype(jnp.bfloat16).astype(f32)
    w2_q = w2_eff.astype(jnp.bfloat16).astype(f32)
    ref = feedforward_reference(
        x_q.reshape(-1, dim), w1_q, b1, w2_q, b2, gamma, beta
    ).reshape(B, Hs, Ws, dim)

    err = jnp.max(jnp.abs(out.astype(f32) - ref))
    assert jnp.allclose(out.astype(f32), ref, atol=5e-2, rtol=5e-2), (
        f"mismatch vs reference (max abs err {err})"
    )

    # TODO(synk): dropout > 0 in training mode (stochastic masking) is omitted;
    # the module is evaluated with eval-mode dropout (identity).
    print("KERNEL_OK")
</pallas_src>

<mosaic_0001>
module attributes {stable_mosaic.version = 11 : i64} {
  func.func @ff_kernel(%arg0: i32, %arg1: memref<64x128xf32, #tpu.memory_space<vmem>>, %arg2: memref<128x256xbf16, #tpu.memory_space<vmem>>, %arg3: memref<1x256xf32, #tpu.memory_space<vmem>>, %arg4: memref<256x256xbf16, #tpu.memory_space<vmem>>, %arg5: memref<1x256xf32, #tpu.memory_space<vmem>>, %arg6: memref<1x128xf32, #tpu.memory_space<vmem>>, %arg7: memref<1x128xf32, #tpu.memory_space<vmem>>, %arg8: memref<128x128xbf16, #tpu.memory_space<vmem>>, %arg9: memref<64x128xbf16, #tpu.memory_space<vmem>>) attributes {dimension_semantics = [#tpu.dimension_semantics<parallel>], iteration_bounds = array<i64: 2>, scalar_prefetch = 0 : i64, scratch_operands = 0 : i64, tpu.core_type = #tpu.core_type<tc>, window_params = [{transform_indices = @transform_0, window_bounds = array<i64: 64, 128>}, {pipeline_mode = #tpu.pipeline_mode<synchronous>, transform_indices = @transform_1, window_bounds = array<i64: 128, 256>}, {pipeline_mode = #tpu.pipeline_mode<synchronous>, transform_indices = @transform_2, window_bounds = array<i64: 1, 256>}, {pipeline_mode = #tpu.pipeline_mode<synchronous>, transform_indices = @transform_3, window_bounds = array<i64: 256, 256>}, {pipeline_mode = #tpu.pipeline_mode<synchronous>, transform_indices = @transform_4, window_bounds = array<i64: 1, 256>}, {pipeline_mode = #tpu.pipeline_mode<synchronous>, transform_indices = @transform_5, window_bounds = array<i64: 1, 128>}, {pipeline_mode = #tpu.pipeline_mode<synchronous>, transform_indices = @transform_6, window_bounds = array<i64: 1, 128>}, {pipeline_mode = #tpu.pipeline_mode<synchronous>, transform_indices = @transform_7, window_bounds = array<i64: 128, 128>}, {transform_indices = @transform_8, window_bounds = array<i64: 64, 128>}]} {
    %c0 = arith.constant 0 : index
    %c0_0 = arith.constant 0 : index
    %0 = vector.load %arg1[%c0, %c0_0] : memref<64x128xf32, #tpu.memory_space<vmem>>, vector<64x128xf32>
    %1 = arith.truncf %0 : vector<64x128xf32> to vector<64x128xbf16>
    %c0_1 = arith.constant 0 : index
    %c0_2 = arith.constant 0 : index
    %2 = vector.load %arg2[%c0_1, %c0_2] : memref<128x256xbf16, #tpu.memory_space<vmem>>, vector<128x256xbf16>
    %cst = arith.constant dense<0.000000e+00> : vector<64x256xf32>
    %3 = tpu.matmul %1, %2, %cst {dimension_numbers = #tpu.dot_dimension_numbers<[1], [0], [0], [1], [0, 0, 1, 1], [], []>} : vector<64x128xbf16>, vector<128x256xbf16>, vector<64x256xf32> -> vector<64x256xf32>
    %c0_3 = arith.constant 0 : index
    %c0_4 = arith.constant 0 : index
    %4 = vector.load %arg3[%c0_3, %c0_4] : memref<1x256xf32, #tpu.memory_space<vmem>>, vector<1x256xf32>
    %5 = vector.broadcast %4 : vector<1x256xf32> to vector<64x256xf32>
    %6 = arith.addf %3, %5 : vector<64x256xf32>
    %cst_5 = arith.constant 0.000000e+00 : f32
    %7 = vector.broadcast %cst_5 : f32 to vector<64x256xf32>
    %8 = arith.maximumf %6, %7 : vector<64x256xf32>
    %9 = arith.truncf %8 : vector<64x256xf32> to vector<64x256xbf16>
    %c0_6 = arith.constant 0 : index
    %c0_7 = arith.constant 0 : index
    %10 = vector.load %arg4[%c0_6, %c0_7] : memref<256x256xbf16, #tpu.memory_space<vmem>>, vector<256x256xbf16>
    %cst_8 = arith.constant dense<0.000000e+00> : vector<64x256xf32>
    %11 = tpu.matmul %9, %10, %cst_8 {dimension_numbers = #tpu.dot_dimension_numbers<[1], [0], [0], [1], [0, 0, 1, 1], [], []>} : vector<64x256xbf16>, vector<256x256xbf16>, vector<64x256xf32> -> vector<64x256xf32>
    %c0_9 = arith.constant 0 : index
    %c0_10 = arith.constant 0 : index
    %12 = vector.load %arg5[%c0_9, %c0_10] : memref<1x256xf32, #tpu.memory_space<vmem>>, vector<1x256xf32>
    %13 = vector.broadcast %12 : vector<1x256xf32> to vector<64x256xf32>
    %14 = arith.addf %11, %13 : vector<64x256xf32>
    %15 = vector.extract_strided_slice %14 {offsets = [0, 0], sizes = [64, 128], strides = [1, 1]} : vector<64x256xf32> to vector<64x128xf32>
    %16 = vector.extract_strided_slice %14 {offsets = [0, 128], sizes = [64, 128], strides = [1, 1]} : vector<64x256xf32> to vector<64x128xf32>
    %17 = arith.subf %15, %16 : vector<64x128xf32>
    %18 = arith.mulf %17, %17 : vector<64x128xf32>
    %19 = arith.truncf %18 : vector<64x128xf32> to vector<64x128xbf16>
    %c0_11 = arith.constant 0 : index
    %c0_12 = arith.constant 0 : index
    %20 = vector.load %arg8[%c0_11, %c0_12] : memref<128x128xbf16, #tpu.memory_space<vmem>>, vector<128x128xbf16>
    %cst_13 = arith.constant dense<0.000000e+00> : vector<64x128xf32>
    %21 = tpu.matmul %19, %20, %cst_13 {dimension_numbers = #tpu.dot_dimension_numbers<[1], [0], [0], [1], [0, 0, 1, 1], [], []>} : vector<64x128xbf16>, vector<128x128xbf16>, vector<64x128xf32> -> vector<64x128xf32>
    %c0_14 = arith.constant 0 : index
    %c0_15 = arith.constant 0 : index
    %22 = vector.load %arg6[%c0_14, %c0_15] : memref<1x128xf32, #tpu.memory_space<vmem>>, vector<1x128xf32>
    %cst_16 = arith.constant 9.99999974E-6 : f32
    %23 = vector.broadcast %cst_16 : f32 to vector<64x128xf32>
    %24 = arith.addf %21, %23 : vector<64x128xf32>
    %25 = math.rsqrt %24 : vector<64x128xf32>
    %26 = vector.broadcast %22 : vector<1x128xf32> to vector<64x128xf32>
    %27 = arith.mulf %26, %25 : vector<64x128xf32>
    %28 = arith.mulf %17, %27 : vector<64x128xf32>
    %c0_17 = arith.constant 0 : index
    %c0_18 = arith.constant 0 : index
    %29 = vector.load %arg7[%c0_17, %c0_18] : memref<1x128xf32, #tpu.memory_space<vmem>>, vector<1x128xf32>
    %30 = vector.broadcast %29 : vector<1x128xf32> to vector<64x128xf32>
    %31 = arith.addf %28, %30 : vector<64x128xf32>
    %32 = arith.truncf %31 : vector<64x128xf32> to vector<64x128xbf16>
    %c0_19 = arith.constant 0 : index
    %c0_20 = arith.constant 0 : index
    %33 = vector.load %arg9[%c0_19, %c0_20] : memref<64x128xbf16, #tpu.memory_space<vmem>>, vector<64x128xbf16>
    tpu.vector_store %arg9[%c0_19, %c0_20], %32 {strides = array<i32>} : memref<64x128xbf16, #tpu.memory_space<vmem>>, vector<64x128xbf16>,
    return
  }
  func.func @transform_0(%arg0: i32) -> (i32, i32) {
    %c0_i32 = arith.constant 0 : i32
    %c0_i32_0 = arith.constant 0 : i32
    return %arg0, %c0_i32 : i32, i32
  }
  func.func @transform_1(%arg0: i32) -> (i32, i32) {
    %c0_i32 = arith.constant 0 : i32
    %c0_i32_0 = arith.constant 0 : i32
    %c0_i32_1 = arith.constant 0 : i32
    return %c0_i32, %c0_i32_0 : i32, i32
  }
  func.func @transform_2(%arg0: i32) -> (i32, i32) {
    %c0_i32 = arith.constant 0 : i32
    %c0_i32_0 = arith.constant 0 : i32
    %c0_i32_1 = arith.constant 0 : i32
    return %c0_i32, %c0_i32_0 : i32, i32
  }
  func.func @transform_3(%arg0: i32) -> (i32, i32) {
    %c0_i32 = arith.constant 0 : i32
    %c0_i32_0 = arith.constant 0 : i32
    %c0_i32_1 = arith.constant 0 : i32
    return %c0_i32, %c0_i32_0 : i32, i32
  }
  func.func @transform_4(%arg0: i32) -> (i32, i32) {
    %c0_i32 = arith.constant 0 : i32
    %c0_i32_0 = arith.constant 0 : i32
    %c0_i32_1 = arith.constant 0 : i32
    return %c0_i32, %c0_i32_0 : i32, i32
  }
  func.func @transform_5(%arg0: i32) -> (i32, i32) {
    %c0_i32 = arith.constant 0 : i32
    %c0_i32_0 = arith.constant 0 : i32
    %c0_i32_1 = arith.constant 0 : i32
    return %c0_i32, %c0_i32_0 : i32, i32
  }
  func.func @transform_6(%arg0: i32) -> (i32, i32) {
    %c0_i32 = arith.constant 0 : i32
    %c0_i32_0 = arith.constant 0 : i32
    %c0_i32_1 = arith.constant 0 : i32
    return %c0_i32, %c0_i32_0 : i32, i32
  }
  func.func @transform_7(%arg0: i32) -> (i32, i32) {
    %c0_i32 = arith.constant 0 : i32
    %c0_i32_0 = arith.constant 0 : i32
    %c0_i32_1 = arith.constant 0 : i32
    return %c0_i32, %c0_i32_0 : i32, i32
  }
  func.func @transform_8(%arg0: i32) -> (i32, i32) {
    %c0_i32 = arith.constant 0 : i32
    %c0_i32_0 = arith.constant 0 : i32
    return %arg0, %c0_i32 : i32, i32
  }
}

</mosaic_0001>

<bundles_post_ra>
// kernel: tpu_custom_call.1
= control target key start
LH: loop header
LB: loop body
LE: loop exit
PB: predicated region body
PF: predicated region fallthrough
CT: control target
= control target key end

     0   :  { %s2071_s0 = inlined_call_operand.hbm [shape: f32[128,128], index: 0, kind: input, shape index: {}]   ;;  %s2072_s1 = inlined_call_operand.hbm [shape: bf16[128,256], index: 1, kind: input, shape index: {}]   ;;  %s2073_s2 = inlined_call_operand.vmem [shape: f32[1,256], index: 2, kind: input, shape index: {}]   ;;  %s2074_s3 = inlined_call_operand.hbm [shape: bf16[256,256], index: 3, kind: input, shape index: {}]   ;;  %s2075_s4 = inlined_call_operand.vmem [shape: f32[1,256], index: 4, kind: input, shape index: {}]   ;;  %s2076_s5 = inlined_call_operand.vmem [shape: f32[1,128], index: 5, kind: input, shape index: {}]   ;;  %s2077_s6 = inlined_call_operand.vmem [shape: f32[1,128], index: 6, kind: input, shape index: {}]   ;;  %s2078_s7 = inlined_call_operand.hbm [shape: bf16[128,128], index: 7, kind: input, shape index: {}]   ;;  %s2079_s8 = inlined_call_operand.hbm [shape: bf16[128,128], index: 8, kind: output, shape index: {}]  }
   0x1   :  { %2086 = sst [smem:[#allocation15_spill]] %s2072_s1 }
   0x2   :  { %2087 = sst [smem:[#allocation16_spill]] %s2074_s3 }
   0x3   :  { %13 = vsyncpa [#allocation3], 0 }
   0x4   :  { %15 = vsyncpa [#allocation3 + $0x1], 0 }
   0x5   :  { %16 = vsyncpa [#allocation6], 0 }
   0x6   :  { %17 = vsyncpa [#allocation9], 0 }
   0x7   :  { %18 = vsyncpa [#allocation4], 0 }
   0x8   :  { %20 = vsyncpa [#allocation4 + $0x1], 0  ;;  %s1788_s27 = smov 0   ;;  %s1790_s28 = smov 0  }
   0x9   :  { %s1792_s29 = smov 0   ;;  %s1794_s30 = smov 0  }
   0xa LB: > { %s1809_s9 = sadd.s32 4294967295, %s1729_s30   ;;  %s1216_s10 = sadd.s32 4294967294, %s1729_s30   ;;  %s1729_s30 = sphi %s1794_s30, %s2110_s30   ;;  %s1725_s29 = sphi %s1792_s29, %s2109_s29   ;;  %s1721_s28 = sphi %s1790_s28, %s2108_s28   ;;  %s1717_s27 = sphi %s1788_s27, %s2107_s27  }
   0xb   : > { %p46_p0 = scmp.ne.s32.totalorder %s1721_s28, %s1717_s27  ;;  %p2080_p1 = scmp.eq.s32.totalorder %s1809_s9, 0 }
   0xc   : > { %p217_p2 = scmp.eq.s32.totalorder %s1809_s9, 1  ;;  %p223_p3 = scmp.eq.s32.totalorder %s1216_s10, 1 }
   0xd   : > { %p1818_p4 = por %p2080_p1, %p46_p0  ;;  %p1217_p5 = scmp.ge.s32.totalorder %s1729_s30, 1 }
   0xe   : > { %p1823_p6 = por %p223_p3, %p46_p0  ;;  %p230_p7 = scmp.lt.s32.totalorder %s1729_s30, 3 }
   0xf   : > { %s2088_s11 = scalar_select %p1818_p4, 1, 0 }
  0x10   : > { %s2089_s12 = scalar_select %p1823_p6, 1, 0 }
  0x11   : > { %p1828_p8 = pnand %p1217_p5, %p230_p7  ;;  %s1731_s14 = smov [#allocation5]  }
  0x12   : > { %s242_s15 = sshll.u32 %s1731_s14, 4  ;;  %s1732_s17 = smov [#allocation7]   ;;  %s243_s15 = int_to_ptr.vmem [resolvable:$true] %s242_s15 }
  0x13   : > { %s2090_s13 = scalar_select %p1828_p8, 1, 0 }
  0x14   : > { %p1387_p9 = pneg %p1828_p8  ;;  %s258_s18 = sshll.u32 %s1732_s17, 4  ;;  %s259_s18 = int_to_ptr.vmem [resolvable:$true] %s258_s18 }
  0x15   : > { %s1733_s19 = smov [#allocation8]   ;;  %s1562_s21 = scalar_lea.vmem %s243_s15, 2048 }
  0x16   : > { %p1837_p11 = pnand %p1387_p9, %p2080_p1  ;;  %s280_s20 = sshll.u32 %s1733_s19, 4  ;;  %s281_s20 = int_to_ptr.vmem [resolvable:$true] %s280_s20 }
  0x17   : > { %p1563_p13 = scmp.ne.s32.totalorder %s243_s15, %s1562_s21  ;;  %p1570_p5 = scmp.lt.s32.totalorder %s243_s15, %s243_s15 }
  0x18   : > { %p1553_p12 = pneg %p1837_p11  ;;  %p1571_p7 = scmp.lt.s32.totalorder %s1562_s21, %s1562_s21 }
  0x1a   : > { %p1565_p0 = pnand %p1563_p13, %p1553_p12  ;;  %p1572_p9 = por %p1571_p7, %p1570_p5 }
  0x1c   : > { %p1566_p3 = pneg %p1565_p0 }
  0x1e   : > { %p1573_p10 = pnand %p1572_p9, %p1566_p3 }
  0x20   : > { %1576 = shalt.err (!%p1573_p10)
}
  0x21   : > { %s2081_s22 = smov 128   ;;  %s2082_s23 = smov 8  }
  0x22   : > { %s2092_s1 = sld [smem:[#allocation15_spill]]  ;;  %s1588_s26 = scalar_lea.vmem %s259_s18, 4096 }
  0x23   : > { %p1589_p13 = scmp.ne.s32.totalorder %s259_s18, %s1588_s26  ;;  %p1596_p3 = scmp.lt.s32.totalorder %s259_s18, %s259_s18 }
  0x24   : > { %p1597_p10 = scmp.lt.s32.totalorder %s1588_s26, %s1588_s26 }
  0x25   : > { %p1591_p0 = pnand %p1589_p13, %p1553_p12 }
  0x26   : > { %p1598_p7 = por %p1597_p10, %p1596_p3 }
  0x27   : > { %p1592_p5 = pneg %p1591_p0 }
  0x28   : > { %1390 = dma.hbm_to_vmem [thread:$0]  (!%p1837_p11), %s2092_s1, 2048, %s243_s15, [#allocation6], %s2081_s22, %s2081_s22, %s2082_s23  }
  0x29   : > { %p1599_p9 = pnand %p1598_p7, %p1592_p5 }
  0x2b   : > { %1602 = shalt.err (!%p1599_p9)
}
  0x2c   : > { %s2093_s3 = sld [smem:[#allocation16_spill]]  ;;  %s1614_s15 = scalar_lea.vmem %s281_s20, 1024 }
  0x2d   : > { %p1615_p1 = scmp.ne.s32.totalorder %s281_s20, %s1614_s15  ;;  %p1622_p3 = scmp.lt.s32.totalorder %s281_s20, %s281_s20 }
  0x2e   : > { %p1623_p5 = scmp.lt.s32.totalorder %s1614_s15, %s1614_s15 }
  0x2f   : > { %p1617_p13 = pnand %p1615_p1, %p1553_p12 }
  0x30   : > { %p1624_p10 = por %p1623_p5, %p1622_p3 }
  0x31   : > { %p1618_p0 = pneg %p1617_p13 }
  0x32   : > { %1393 = dma.hbm_to_vmem [thread:$0]  (!%p1837_p11), %s2093_s3, 4096, %s259_s18, [#allocation6], %s2081_s22, %s2081_s22, %s2082_s23  }
  0x33   : > { %p1625_p7 = pnand %p1624_p10, %p1618_p0 }
  0x35   : > { %1628 = shalt.err (!%p1625_p7)
}
  0x36   : > { %s1736_s17 = smov 64   ;;  %s1737_s18 = smov 4  }
  0x37   : > { %1396 = dma.hbm_to_vmem [thread:$0]  (!%p1837_p11), %s2078_s7, 1024, %s281_s20, [#allocation9], %s1736_s17, %s1736_s17, %s1737_s18  }
  0x38   : > { %s1874_s24 = sadd.s32 1, %s1729_s30   ;;  %s33_s26 = sadd.s32 1, %s1725_s29 }
  0x39   : > { %s30_s25 = ssub.s32 %s1729_s30, %s1874_s24  ;;  %p40_p12 = scmp.ne.s32.totalorder %s1725_s29, %s1721_s28 }
  0x3a   : > { %p31_p1 = scmp.eq.s32.totalorder %s30_s25, 0  ;;  %p41_p9 = scmp.eq.s32.totalorder %s1729_s30, 0 }
  0x3b   : > { %p1408_p13 = scmp.lt.s32.totalorder %s1729_s30, 2  ;;  %p1888_p3 = por %p217_p2, %p40_p12 }
  0x3c   : > { %s1884_s10 = scalar_select %p31_p1, %s1725_s29, %s33_s26  }
  0x3d   : > { %p42_p0 = por %p41_p9, %p40_p12  ;;  %s294_s16 = sand.u32 1, %s1725_s29  }
  0x3e   : > { %s2094_s14 = scalar_select %p1888_p3, 1, 0 }
  0x3f   : > { %s1302_s15 = sshll.u32 %s1729_s30, 10  ;;  %s1222_s20 = sshll.u32 %s294_s16, 6 }
  0x40   : > { %s1897_s19 = scalar_lea.hbm %s2071_s0, %s1302_s15  ;;  %s298_s21 = scalar_lea.vmem [#allocation2], %s1222_s20 }
  0x41   : > { %s305_s25 = sshll.u32 %s298_s21, 4  ;;  %p1899_p11 = pnand %p1408_p13, %p42_p0  ;;  %s1903_s25 = int_to_ptr.vmem [resolvable:$true] %s305_s25 }
  0x42   : > { %s1905_s22 = scalar_lea.sflag [#allocation3], %s294_s16  ;;  %s1629_s23 = scalar_lea.hbm %s1897_s19, 1024 }
  0x43   : > { %p1630_p2 = scmp.ne.s32.totalorder %s1897_s19, %s1629_s23  ;;  %p1631_p5 = pneg %p1899_p11 }
  0x44   : > { %s1634_s20 = scalar_lea.hbm %s2071_s0, 2048  ;;  %p1635_p1 = scmp.lt.s32.totalorder %s1897_s19, %s2071_s0 }
  0x45   : > { %p1632_p10 = pnand %p1631_p5, %p1630_p2  ;;  %p1636_p12 = scmp.lt.s32.totalorder %s1634_s20, %s1629_s23 }
  0x47   : > { %p1633_p7 = pneg %p1632_p10  ;;  %p1637_p9 = por %p1636_p12, %p1635_p1 }
  0x49   : > { %p1638_p13 = pnand %p1637_p9, %p1633_p7 }
  0x4b   : > { %1641 = shalt.err (!%p1638_p13)
}
  0x4c   : > { %s1642_s16 = scalar_lea.vmem %s1903_s25, 1024  ;;  %s1738_s1 = smov [#allocation2]  }
  0x4d   : > { %p1643_p0 = scmp.ne.s32.totalorder %s1903_s25, %s1642_s16  ;;  %s1647_s3 = sshll.u32 %s1738_s1, 4  ;;  %s1648_s3 = int_to_ptr.vmem [resolvable:$false] %s1647_s3 }
  0x4e   : > { %s1649_s15 = scalar_lea.vmem %s1648_s3, 2048  ;;  %p1650_p10 = scmp.lt.s32.totalorder %s1903_s25, %s1648_s3 }
  0x4f   : > { %p1645_p6 = pnand %p1643_p0, %p1631_p5  ;;  %p1651_p3 = scmp.lt.s32.totalorder %s1649_s15, %s1642_s16 }
  0x51   : > { %p1646_p2 = pneg %p1645_p6  ;;  %p1652_p4 = por %p1651_p3, %p1650_p10 }
  0x53   : > { %p1653_p8 = pnand %p1652_p4, %p1646_p2 }
  0x55   : > { %1656 = shalt.err (!%p1653_p8)
}
  0x56   : > { %s2096_s23 = smov 8   ;;  %s2097_s17 = smov 128  }
  0x57   : > { %1400 = dma.hbm_to_vmem [thread:$0]  (!%p1899_p11), %s1897_s19, 1024, %s1903_s25, %s1905_s22, %s2097_s17, %s2097_s17, %s2096_s23  }
  0x58   : > { %p2098_p6 = scmp.ne.s32.totalorder %s2090_s13, 0 }
  0x59   : > { %s1932_s1 = sand.u32 (!%p2098_p6), 1, %s1721_s28   ;;  %p2099_p4 = scmp.ne.s32.totalorder (!%p2098_p6), %s2088_s11, 0 }
  0x5a   : > { %317 = sbr.rel (%p2098_p6) target bundleno = 810 (0x32a), region = 52  ;;  %s1226_s3 = sshll.u32 (!%p2098_p6), %s1932_s1, 6 }
  0x5b   : > { %s320_s20 = scalar_lea.sflag (!%p2098_p6), [#allocation3], %s1932_s1  ;;  %s1936_s18 = scalar_lea.vmem (!%p2098_p6), [#allocation2], %s1226_s3 }
  0x5f   : > { %1700 = dma.done.wait (%p2099_p4), %s320_s20, 1024  }
  0x60   : > { %1702 = vsyncadd (%p2099_p4), %s320_s20, 4294966272  ;;  %p2100_p8 = scmp.eq.s32.totalorder %s1809_s9, 0 }
  0x62   : > { %1704 = dma.done.wait (%p2100_p8), [#allocation6], 6144   ;;  %p2101_p3 = pmov %p2100_p8 }
  0x64   : > { %1706 = vsyncadd (%p2101_p3), [#allocation6], 4294961152  ;;  %p2102_p11 = pmov %p2101_p3 }
  0x65   : > { %p2103_p5 = pmov %p2101_p3 }
  0x66   : > { %1708 = dma.done.wait (%p2102_p11), [#allocation9], 1024  }
  0x67   : > { %1710 = vsyncadd (%p2103_p5), [#allocation9], 4294966272  ;;  %v1739_v0 = vmov 0   ;;  %v1455_v1 = vld [vmem:[#allocation5 + $0x74] ss:$8 sps:$4 sm:$0xff]   ;;  %v371_v26 = vld [vmem:[%s1936_s18] sm:$0xff] }
  0x68   : > { %523 = vmatprep.mubr.bf16.mxu0 %v1739_v0  ;;  %v1457_v2 = vld [vmem:[#allocation5 + $0x70] ss:$8 sps:$4 sm:$0xff]   ;;  %491 = vmatprep.subr.bf16.mxu0 %v1455_v1  ;;  %v1458_v3 = vld [vmem:[#allocation5 + $0x64] ss:$8 sps:$4 sm:$0xff]   ;;  %v1460_v4 = vld [vmem:[#allocation5 + $0x60] ss:$8 sps:$4 sm:$0xff]  }
  0x69   : > { %492 = vmatpush1.bf16.msra.mxu0 %v1457_v2  ;;  %v1461_v5 = vld [vmem:[#allocation5 + $0x54] ss:$8 sps:$4 sm:$0xff]   ;;  %v1463_v6 = vld [vmem:[#allocation5 + $0x50] ss:$8 sps:$4 sm:$0xff]   ;;  %v1464_v7 = vld [vmem:[#allocation5 + $0x44] ss:$8 sps:$4 sm:$0xff]  }
  0x6a   : > { %493 = vmatprep.subr.bf16.mxu0 %v1458_v3  ;;  %v1466_v8 = vld [vmem:[#allocation5 + $0x40] ss:$8 sps:$4 sm:$0xff]   ;;  %v1467_v9 = vld [vmem:[#allocation5 + $0x34] ss:$8 sps:$4 sm:$0xff]   ;;  %v1481_v11 = vld [vmem:[#allocation7 + $0x70] ss:$8 sps:$4 sm:$0xff]  }
  0x6b   : > { %v1479_v10 = vld [vmem:[#allocation7 + $0x74] ss:$8 sps:$4 sm:$0xff]   ;;  %v1469_v12 = vld [vmem:[#allocation5 + $0x30] ss:$8 sps:$4 sm:$0xff]   ;;  %v1482_v13 = vld [vmem:[#allocation7 + $0x64] ss:$8 sps:$4 sm:$0xff]  }
  0x6c   : > { %v1470_v14 = vld [vmem:[#allocation5 + $0x24] ss:$8 sps:$4 sm:$0xff]   ;;  %792 = vmatprep.subr.bf16.mxu1 %v1479_v10  ;;  %v1484_v15 = vld [vmem:[#allocation7 + $0x60] ss:$8 sps:$4 sm:$0xff]   ;;  %v1485_v16 = vld [vmem:[#allocation7 + $0x54] ss:$8 sps:$4 sm:$0xff]  }
  0x6d   : > { %494 = vmatpush1.bf16.msra.mxu0 %v1460_v4  ;;  %793 = vmatpush1.bf16.msra.mxu1 %v1481_v11  ;;  %v1472_v17 = vld [vmem:[#allocation5 + $0x20] ss:$8 sps:$4 sm:$0xff]   ;;  %v1473_v18 = vld [vmem:[#allocation5 + $0x14] ss:$8 sps:$4 sm:$0xff]   ;;  %v1487_v19 = vld [vmem:[#allocation7 + $0x50] ss:$8 sps:$4 sm:$0xff]  }
  0x6e   : > { %495 = vmatprep.subr.bf16.mxu0 %v1461_v5  ;;  %794 = vmatprep.subr.bf16.mxu1 %v1482_v13  ;;  %v1488_v20 = vld [vmem:[#allocation7 + $0x44] ss:$8 sps:$4 sm:$0xff]   ;;  %v1475_v21 = vld [vmem:[#allocation5 + $0x10] ss:$8 sps:$4 sm:$0xff]   ;;  %v1490_v23 = vld [vmem:[#allocation7 + $0x40] ss:$8 sps:$4 sm:$0xff]  }
  0x6f   : > { %v1476_v22 = vld [vmem:[#allocation5 + $0x4] ss:$8 sps:$4 sm:$0xff]   ;;  %v1478_v24 = vld [vmem:[#allocation5] ss:$8 sps:$4 sm:$0xff]   ;;  %v1491_v25 = vld [vmem:[#allocation7 + $0x34] ss:$8 sps:$4 sm:$0xff]  }
  0x70   : > { %v372_v27 = vld [vmem:[%s1936_s18 + $0x8] sm:$0xff]  ;;  %v1493_v28 = vld [vmem:[#allocation7 + $0x30] ss:$8 sps:$4 sm:$0xff]   ;;  %v1497_v32 = vld [vmem:[#allocation7 + $0x14] ss:$8 sps:$4 sm:$0xff]   ;;  %s1230_s15 = sshll.u32 %s1932_s1, 5 }
  0x71   : > { %496 = vmatpush1.bf16.msra.mxu0 %v1463_v6  ;;  %795 = vmatpush1.bf16.msra.mxu1 %v1484_v15  ;;  %v379_v29 = vpack.c.bf16 %v372_v27, %v371_v26  ;;  %v1494_v30 = vld [vmem:[#allocation7 + $0x24] ss:$8 sps:$4 sm:$0xff]   ;;  %v1496_v31 = vld [vmem:[#allocation7 + $0x20] ss:$8 sps:$4 sm:$0xff]   ;;  %v373_v33 = vld [vmem:[%s1936_s18 + $0x10] sm:$0xff]  ;;  %s367_s23 = scalar_lea.vmem [#allocation10], %s1230_s15 }
  0x72   : > { %497 = vmatprep.subr.bf16.mxu0 %v1464_v7  ;;  %796 = vmatprep.subr.bf16.mxu1 %v1485_v16  ;;  %v374_v34 = vld [vmem:[%s1936_s18 + $0x18] sm:$0xff]  ;;  %v1500_v37 = vld [vmem:[#allocation7 + $0x4] ss:$8 sps:$4 sm:$0xff]   ;;  %v1502_v38 = vld [vmem:[#allocation7] ss:$8 sps:$4 sm:$0xff]   ;;  %s1311_s17 = sshll.u32 %s1809_s9, 9 }
  0x73   : > { %v1499_v35 = vld [vmem:[#allocation7 + $0x10] ss:$8 sps:$4 sm:$0xff]   ;;  %v380_v36 = vpack.c.bf16 %v374_v34, %v373_v33  ;;  %v1503_v39 = vld [vmem:[#allocation7 + $0xf4] ss:$8 sps:$4 sm:$0xff]   ;;  %v375_v40 = vld [vmem:[%s1936_s18 + $0x20] sm:$0xff]  ;;  %s1114_s3 = sshll.u32 %s367_s23, 4  ;;  %s2026_s11 = scalar_lea.hbm %s2079_s8, %s1311_s17  ;;  %s2028_s3 = int_to_ptr.vmem [resolvable:$true] %s1114_s3 }
  0x74   : > { %v376_v41 = vld [vmem:[%s1936_s18 + $0x28] sm:$0xff]  ;;  %v1505_v42 = vld [vmem:[#allocation7 + $0xf0] ss:$8 sps:$4 sm:$0xff]   ;;  %v1509_v46 = vld [vmem:[#allocation7 + $0xd4] ss:$8 sps:$4 sm:$0xff]   ;;  %s1101_s9 = scalar_lea.sflag [#allocation4], %s1932_s1 }
  0x75   : > { %498 = vmatpush1.bf16.msra.mxu0 %v1466_v8  ;;  %797 = vmatpush1.bf16.msra.mxu1 %v1487_v19  ;;  %v381_v43 = vpack.c.bf16 %v376_v41, %v375_v40  ;;  %v1506_v44 = vld [vmem:[#allocation7 + $0xe4] ss:$8 sps:$4 sm:$0xff]   ;;  %v1508_v45 = vld [vmem:[#allocation7 + $0xe0] ss:$8 sps:$4 sm:$0xff]   ;;  %v377_v47 = vld [vmem:[%s1936_s18 + $0x30] sm:$0xff]  ;;  %s1657_s13 = scalar_lea.vmem %s2028_s3, 512 }
  0x76   : > { %499 = vmatprep.subr.bf16.mxu0 %v1467_v9  ;;  %798 = vmatprep.subr.bf16.mxu1 %v1488_v20  ;;  %v378_v48 = vld [vmem:[%s1936_s18 + $0x38] sm:$0xff]  ;;  %v1512_v51 = vld [vmem:[#allocation7 + $0xc4] ss:$8 sps:$4 sm:$0xff]   ;;  %v1514_v52 = vld [vmem:[#allocation7 + $0xc0] ss:$8 sps:$4 sm:$0xff]   ;;  %p1658_p7 = scmp.ne.s32.totalorder %s2028_s3, %s1657_s13  ;;  %p2104_p1 = scmp.ne.s32.totalorder %s2094_s14, 0 }
  0x77   : > { %v1511_v49 = vld [vmem:[#allocation7 + $0xd0] ss:$8 sps:$4 sm:$0xff]   ;;  %v382_v50 = vpack.c.bf16 %v378_v48, %v377_v47  ;;  %v1515_v53 = vld [vmem:[#allocation7 + $0xb4] ss:$8 sps:$4 sm:$0xff]   ;;  %v1518_v55 = vld [vmem:[#allocation7 + $0xa4] ss:$8 sps:$4 sm:$0xff]  }
  0x78   : > { %v1517_v54 = vld [vmem:[#allocation7 + $0xb0] ss:$8 sps:$4 sm:$0xff]   ;;  %v1520_v56 = vld [vmem:[#allocation7 + $0xa0] ss:$8 sps:$4 sm:$0xff]   ;;  %v1521_v57 = vld [vmem:[#allocation7 + $0x94] ss:$8 sps:$4 sm:$0xff]   ;;  %p1659_p12 = pnand %p1658_p7, %p2104_p1 }
  0x79   : > { %500 = vmatpush1.bf16.msra.mxu0 %v1469_v12  ;;  %799 = vmatpush1.bf16.msra.mxu1 %v1490_v23  ;;  %v1523_v58 = vld [vmem:[#allocation7 + $0x90] ss:$8 sps:$4 sm:$0xff]   ;;  %v1524_v59 = vld [vmem:[#allocation7 + $0x84] ss:$8 sps:$4 sm:$0xff]   ;;  %v1526_v60 = vld [vmem:[#allocation7 + $0x80] ss:$8 sps:$4 sm:$0xff]  }
  0x7a   : > { %501 = vmatprep.subr.bf16.mxu0 %v1470_v14  ;;  %800 = vmatprep.subr.bf16.mxu1 %v1491_v25  ;;  %v1527_v61 = vld [vmem:[#allocation8 + $0x38] sm:$0xff]   ;;  %v1528_v62 = vld [vmem:[#allocation8 + $0x30] sm:$0xff]   ;;  %v1529_v63 = vld [vmem:[#allocation8 + $0x28] sm:$0xff]   ;;  %p1660_p9 = pneg %p1659_p12  ;;  %s1740_s22 = smov [#allocation10]  }
  0x7b   : > { %v399_v4 = vld [vmem:[%s2073_s2] sm:$0x3]  ;;  %s1661_s19 = sshll.u32 %s1740_s22, 4  ;;  %s1662_s19 = int_to_ptr.vmem [resolvable:$false] %s1661_s19 }
  0x7c   : > { %s1663_s25 = scalar_lea.vmem %s1662_s19, 1024  ;;  %p1664_p13 = scmp.lt.s32.totalorder %s2028_s3, %s1662_s19 }
  0x7d   : > { %502 = vmatpush1.bf16.msra.mxu0 %v1472_v17  ;;  %801 = vmatpush1.bf16.msra.mxu1 %v1493_v28  ;;  %p1665_p0 = scmp.lt.s32.totalorder %s1663_s25, %s1657_s13 }
  0x7e   : > { %503 = vmatprep.subr.bf16.mxu0 %v1473_v18  ;;  %802 = vmatprep.subr.bf16.mxu1 %v1494_v30 }
  0x7f   : > { %p1666_p2 = por %p1665_p0, %p1664_p13 }
  0x81   : > { %504 = vmatpush1.bf16.msra.mxu0 %v1475_v21  ;;  %803 = vmatpush1.bf16.msra.mxu1 %v1496_v31  ;;  %p1667_p10 = pnand %p1666_p2, %p1660_p9 }
  0x82   : > { %505 = vmatprep.subr.bf16.mxu0 %v1476_v22  ;;  %804 = vmatprep.subr.bf16.mxu1 %v1497_v32 }
  0x85   : > { %506 = vmatpush1.bf16.msra.mxu0 %v1478_v24  ;;  %805 = vmatpush1.bf16.msra.mxu1 %v1499_v35 }
  0x86   : > { %806 = vmatprep.subr.bf16.mxu1 %v1500_v37  ;;  %1347 = vmatprep.subr.bf16.mxu0 %v1527_v61 }
  0x88   : > { %524 = vmatmul.mubr.bf16.vlgmr.msra.gmra.mxu0 %v379_v29 }
  0x89   : > { %533 = vmatprep.mubr.bf16.mxu0 %v1739_v0  ;;  %807 = vmatpush1.bf16.msra.mxu1 %v1502_v38 }
  0x8a   : > { %808 = vmatprep.subr.bf16.mxu1 %v1503_v39  ;;  %1348 = vmatpush3.bf16.msra.mxu0 %v1527_v61 }
  0x8b   : > { %1349 = vmatprep.subr.bf16.mxu0 %v1528_v62 }
  0x8d   : > { %809 = vmatpush2.bf16.msra.mxu1 %v1505_v42 }
  0x8e   : > { %810 = vmatprep.subr.bf16.mxu1 %v1506_v44  ;;  %1350 = vmatpush3.bf16.msra.mxu0 %v1528_v62 }
  0x8f   : > { %1351 = vmatprep.subr.bf16.mxu0 %v1529_v63 }
  0x90   : > { %534 = vmatmul.mubr.bf16.gmra.mxu0 %v380_v36 }
  0x91   : > { %543 = vmatprep.mubr.bf16.mxu0 %v1739_v0  ;;  %811 = vmatpush2.bf16.msra.mxu1 %v1508_v45 }
  0x92   : > { %812 = vmatprep.subr.bf16.mxu1 %v1509_v46  ;;  %1352 = vmatpush3.bf16.msra.mxu0 %v1529_v63  ;;  %v1530_v63 = vld [vmem:[#allocation8 + $0x20] sm:$0xff]  }
  0x93   : > { %1353 = vmatprep.subr.bf16.mxu0 %v1530_v63 }
  0x95   : > { %813 = vmatpush2.bf16.msra.mxu1 %v1511_v49 }
  0x96   : > { %814 = vmatprep.subr.bf16.mxu1 %v1512_v51  ;;  %1354 = vmatpush3.bf16.msra.mxu0 %v1530_v63 }
  0x98   : > { %544 = vmatmul.mubr.bf16.gmra.mxu0 %v381_v43 }
  0x99   : > { %553 = vmatprep.mubr.bf16.mxu0 %v1739_v0  ;;  %815 = vmatpush2.bf16.msra.mxu1 %v1514_v52  ;;  %v401_v0 = vlaneseq }
  0x9a   : > { %816 = vmatprep.subr.bf16.mxu1 %v1515_v53 }
  0x9b   : > { %v1962_v1 = vshrl.u32 %v401_v0, 7  ;;  %v1531_v0 = vld [vmem:[#allocation8 + $0x18] sm:$0xff]  }
  0x9c   : > { %1355 = vmatprep.subr.bf16.mxu0 %v1531_v0 }
  0x9d   : > { %817 = vmatpush2.bf16.msra.mxu1 %v1517_v54  ;;  %v407_v2 = vsub.s32 1, %v1962_v1  ;;  %v403_v3 = vsub.s32 0, %v1962_v1  ;;  %1356 = vmatpush3.bf16.msra.mxu0 %v1531_v0 }
  0x9e   : > { %818 = vmatprep.subr.bf16.mxu1 %v1518_v55 }
  0x9f   : > { %v408_v6 = vrot.slane %v399_v4, %v407_v2  ;;  %v404_v7 = vrot.slane %v399_v4, %v403_v3  ;;  %v1532_v4 = vld [vmem:[#allocation8 + $0x10] sm:$0xff]  }
  0xa0   : > { %554 = vmatmul.mubr.bf16.gmra.mxu0 %v382_v50  ;;  %1357 = vmatprep.subr.bf16.mxu0 %v1532_v4 }
  0xa1   : > { %819 = vmatpush2.bf16.msra.mxu1 %v1520_v56  ;;  %1358 = vmatpush3.bf16.msra.mxu0 %v1532_v4 }
  0xa2   : > { %820 = vmatprep.subr.bf16.mxu1 %v1521_v57 }
  0xa5   : > { %821 = vmatpush2.bf16.msra.mxu1 %v1523_v58 }
  0xa6   : > { %822 = vmatprep.subr.bf16.mxu1 %v1524_v59 }
  0xa9   : > { %823 = vmatpush2.bf16.msra.mxu1 %v1526_v60 }
 0x148   : > { %v525_v5 = vpop.f32.mrf.mxu0 }
 0x149   : > { %v526_v12 = vadd.f32 %v525_v5, %v404_v7  ;;  %v1533_v5 = vld [vmem:[#allocation8 + $0x8] sm:$0xff]  }
 0x14a   : > { %v527_v8 = vpop.f32.mrf.mxu0  ;;  %1359 = vmatprep.subr.bf16.mxu0 %v1533_v5 }
 0x14b   : > { %v528_v10 = vadd.f32 %v527_v8, %v408_v6  ;;  %v564_v19 = vmax.f32 %v526_v12, 0.0  ;;  %1360 = vmatpush3.bf16.msra.mxu0 %v1533_v5 }
 0x14c   : > { %v529_v9 = vpop.f32.mrf.mxu0 }
 0x14d   : > { %v530_v11 = vadd.f32 %v529_v9, %v404_v7  ;;  %v565_v17 = vmax.f32 %v528_v10, 0.0 }
 0x14e   : > { %v531_v13 = vpop.f32.mrf.mxu0 }
 0x14f   : > { %v532_v14 = vadd.f32 %v531_v13, %v408_v6  ;;  %v566_v15 = vmax.f32 %v530_v11, 0.0 }
 0x150   : > { %v535_v16 = vpop.f32.mrf.mxu0 }
 0x151   : > { %v567_v18 = vmax.f32 %v532_v14, 0.0  ;;  %v580_v22 = vpack.c.bf16 %v566_v15, %v564_v19  ;;  %v536_v26 = vadd.f32 %v535_v16, %v404_v7 }
 0x152   : > { %v537_v20 = vpop.f32.mrf.mxu0 }
 0x153   : > { %v581_v21 = vpack.c.bf16 %v567_v18, %v565_v17  ;;  %v538_v24 = vadd.f32 %v537_v20, %v408_v6  ;;  %v568_v33 = vmax.f32 %v536_v26, 0.0 }
 0x154   : > { %v539_v23 = vpop.f32.mrf.mxu0 }
 0x155   : > { %v540_v25 = vadd.f32 %v539_v23, %v404_v7  ;;  %824 = vmatprep.mubr.bf16.mxu1 %v581_v21  ;;  %v569_v31 = vmax.f32 %v538_v24, 0.0 }
 0x156   : > { %v541_v27 = vpop.f32.mrf.mxu0  ;;  %825 = vmatmul.mubr.bf16.vlgmr.msra.gmra.mxu1 %v580_v22 }
 0x157   : > { %v542_v28 = vadd.f32 %v541_v27, %v408_v6  ;;  %v570_v29 = vmax.f32 %v540_v25, 0.0 }
 0x158   : > { %v545_v30 = vpop.f32.mrf.mxu0 }
 0x159   : > { %v571_v32 = vmax.f32 %v542_v28, 0.0  ;;  %v582_v36 = vpack.c.bf16 %v570_v29, %v568_v33  ;;  %v546_v40 = vadd.f32 %v545_v30, %v404_v7 }
 0x15a   : > { %v547_v34 = vpop.f32.mrf.mxu0 }
 0x15b   : > { %v583_v35 = vpack.c.bf16 %v571_v32, %v569_v31  ;;  %v548_v38 = vadd.f32 %v547_v34, %v408_v6  ;;  %v572_v47 = vmax.f32 %v546_v40, 0.0 }
 0x15c   : > { %v549_v37 = vpop.f32.mrf.mxu0 }
 0x15d   : > { %v550_v39 = vadd.f32 %v549_v37, %v404_v7  ;;  %834 = vmatprep.mubr.bf16.mxu1 %v583_v35  ;;  %v573_v45 = vmax.f32 %v548_v38, 0.0 }
 0x15e   : > { %v551_v41 = vpop.f32.mrf.mxu0  ;;  %835 = vmatmul.mubr.bf16.gmra.mxu1 %v582_v36 }
 0x15f   : > { %v552_v42 = vadd.f32 %v551_v41, %v408_v6  ;;  %v574_v43 = vmax.f32 %v550_v39, 0.0 }
 0x160   : > { %v555_v44 = vpop.f32.mrf.mxu0 }
 0x161   : > { %v575_v46 = vmax.f32 %v552_v42, 0.0  ;;  %v584_v50 = vpack.c.bf16 %v574_v43, %v572_v47  ;;  %v556_v54 = vadd.f32 %v555_v44, %v404_v7 }
 0x162   : > { %v557_v48 = vpop.f32.mrf.mxu0 }
 0x163   : > { %v585_v49 = vpack.c.bf16 %v575_v46, %v573_v45  ;;  %v558_v52 = vadd.f32 %v557_v48, %v408_v6  ;;  %v576_v60 = vmax.f32 %v556_v54, 0.0 }
 0x164   : > { %v559_v51 = vpop.f32.mrf.mxu0 }
 0x165   : > { %v560_v53 = vadd.f32 %v559_v51, %v404_v7  ;;  %844 = vmatprep.mubr.bf16.mxu1 %v585_v49  ;;  %v577_v58 = vmax.f32 %v558_v52, 0.0  ;;  %v620_v7 = vld [vmem:[%s2075_s4] sm:$0x3] }
 0x166   : > { %v561_v55 = vpop.f32.mrf.mxu0  ;;  %845 = vmatmul.mubr.bf16.gmra.mxu1 %v584_v50  ;;  %v629_v8 = vrot.slane %v620_v7, %v407_v2  ;;  %v625_v10 = vrot.slane %v620_v7, %v403_v3 }
 0x167   : > { %v562_v56 = vadd.f32 %v561_v55, %v408_v6  ;;  %v578_v57 = vmax.f32 %v560_v53, 0.0  ;;  %v1534_v6 = vld [vmem:[#allocation8] sm:$0xff]  }
 0x168   : > { %1361 = vmatprep.subr.bf16.mxu0 %v1534_v6 }
 0x169   : > { %v579_v59 = vmax.f32 %v562_v56, 0.0  ;;  %v586_v62 = vpack.c.bf16 %v578_v57, %v576_v60  ;;  %1362 = vmatpush3.bf16.msra.mxu0 %v1534_v6  ;;  %v1287_v6 = vld [vmem:[%s2076_s5] ss:$0 sm:$0xff] }
 0x16b   : > { %v587_v61 = vpack.c.bf16 %v579_v59, %v577_v58 }
 0x16d   : > { %854 = vmatprep.mubr.bf16.mxu1 %v587_v61 }
 0x16e   : > { %855 = vmatmul.mubr.bf16.gmra.mxu1 %v586_v62 }
 0x216   : > { %v826_v9 = vpop.f32.mrf.mxu1 }
 0x217   : > { %v827_v14 = vadd.f32 %v826_v9, %v625_v10 }
 0x218   : > { %v828_v11 = vpop.f32.mrf.mxu1 }
 0x219   : > { %v829_v12 = vadd.f32 %v828_v11, %v629_v8 }
 0x21a   : > { %v830_v13 = vpop.f32.mrf.mxu1 }
 0x21b   : > { %v1980_v16 = vsub.f32 %v827_v14, %v829_v12  ;;  %v831_v17 = vadd.f32 %v830_v13, %v625_v10 }
 0x21c   : > { %v832_v15 = vpop.f32.mrf.mxu1 }
 0x21d   : > { %v833_v18 = vadd.f32 %v832_v15, %v629_v8  ;;  %v873_v2 = vmul.f32 %v1980_v16, %v1980_v16 }
 0x21e   : > { %v836_v19 = vpop.f32.mrf.mxu1 }
 0x21f   : > { %v1982_v20 = vsub.f32 %v831_v17, %v833_v18  ;;  %v837_v23 = vadd.f32 %v836_v19, %v625_v10 }
 0x220   : > { %v838_v21 = vpop.f32.mrf.mxu1 }
 0x221   : > { %v874_v1 = vmul.f32 %v1982_v20, %v1982_v20  ;;  %v839_v3 = vadd.f32 %v838_v21, %v629_v8 }
 0x222   : > { %v840_v22 = vpop.f32.mrf.mxu1 }
 0x223   : > { %v881_v24 = vpack.c.bf16 %v874_v1, %v873_v2  ;;  %v867_v26 = vsub.f32 %v837_v23, %v839_v3  ;;  %v841_v27 = vadd.f32 %v840_v22, %v625_v10  ;;  %v1288_v2 = vld [vmem:[%s2077_s6] ss:$0 sm:$0xff] }
 0x224   : > { %v842_v25 = vpop.f32.mrf.mxu1 }
 0x225   : > { %v843_v28 = vadd.f32 %v842_v25, %v629_v8  ;;  %1363 = vmatprep.mubr.bf16.mxu0 %v881_v24  ;;  %v875_v32 = vmul.f32 %v867_v26, %v867_v26 }
 0x226   : > { %v846_v29 = vpop.f32.mrf.mxu1 }
 0x227   : > { %v1988_v30 = vsub.f32 %v841_v27, %v843_v28  ;;  %v847_v37 = vadd.f32 %v846_v29, %v625_v10 }
 0x228   : > { %v848_v31 = vpop.f32.mrf.mxu1 }
 0x229   : > { %v876_v33 = vmul.f32 %v1988_v30, %v1988_v30  ;;  %v849_v34 = vadd.f32 %v848_v31, %v629_v8 }
 0x22a   : > { %v850_v35 = vpop.f32.mrf.mxu1 }
 0x22b   : > { %v882_v36 = vpack.c.bf16 %v876_v33, %v875_v32  ;;  %v1992_v39 = vsub.f32 %v847_v37, %v849_v34  ;;  %v851_v40 = vadd.f32 %v850_v35, %v625_v10 }
 0x22c   : > { %v852_v38 = vpop.f32.mrf.mxu1 }
 0x22d   : > { %v853_v41 = vadd.f32 %v852_v38, %v629_v8  ;;  %1364 = vmatmul.mubr.bf16.vlgmr.msra.gmra.mxu0 %v882_v36  ;;  %v877_v45 = vmul.f32 %v1992_v39, %v1992_v39 }
 0x22e   : > { %v856_v42 = vpop.f32.mrf.mxu1 }
 0x22f   : > { %v1994_v43 = vsub.f32 %v851_v40, %v853_v41  ;;  %v857_v49 = vadd.f32 %v856_v42, %v625_v10 }
 0x230   : > { %v858_v44 = vpop.f32.mrf.mxu1 }
 0x231   : > { %v878_v46 = vmul.f32 %v1994_v43, %v1994_v43  ;;  %v859_v47 = vadd.f32 %v858_v44, %v629_v8 }
 0x232   : > { %v860_v48 = vpop.f32.mrf.mxu1 }
 0x233   : > { %v883_v50 = vpack.c.bf16 %v878_v46, %v877_v45  ;;  %v2000_v52 = vsub.f32 %v857_v49, %v859_v47  ;;  %v861_v53 = vadd.f32 %v860_v48, %v625_v10 }
 0x234   : > { %v862_v51 = vpop.f32.mrf.mxu1 }
 0x235   : > { %v863_v54 = vadd.f32 %v862_v51, %v629_v8  ;;  %1367 = vmatprep.mubr.bf16.mxu0 %v883_v50  ;;  %v879_v56 = vmul.f32 %v2000_v52, %v2000_v52 }
 0x237   : > { %v2002_v55 = vsub.f32 %v861_v53, %v863_v54 }
 0x239   : > { %v880_v57 = vmul.f32 %v2002_v55, %v2002_v55 }
 0x23b   : > { %v884_v58 = vpack.c.bf16 %v880_v57, %v879_v56 }
 0x23d   : > { %1368 = vmatmul.mubr.bf16.gmra.mxu0 %v884_v58 }
 0x2ed   : > { %v1365_v59 = vpop.f32.mrf.mxu0 }
 0x2ee   : > { %v993_v60 = vadd.f32 1e-05, %v1365_v59 }
 0x2ef   : > { %v984_v61 = vpop.f32.mrf.mxu0 }
 0x2f0   : > { %1535 = vrsqrt.f32 %v993_v60  ;;  %v985_v62 = vadd.f32 1e-05, %v984_v61 }
 0x2f1   : > { %v1366_v63 = vpop.f32.mrf.mxu0 }
 0x2f2   : > { %1537 = vrsqrt.f32 %v985_v62  ;;  %v996_v0 = vadd.f32 1e-05, %v1366_v63 }
 0x2f3   : > { %v987_v4 = vpop.f32.mrf.mxu0 }
 0x2f4   : > { %1539 = vrsqrt.f32 %v996_v0  ;;  %v988_v5 = vadd.f32 1e-05, %v987_v4 }
 0x2f6   : > { %1541 = vrsqrt.f32 %v988_v5 }
 0x2fd   : > { %v1536_v7 = vpop.eup %1535  ;;  %v1369_v8 = vpop.f32.mrf.mxu0 }
 0x2fe   : > { %v1031_v9 = vmul.f32 %v1536_v7, %v1287_v6  ;;  %v1009_v10 = vadd.f32 1e-05, %v1369_v8 }
 0x2ff   : > { %v1538_v11 = vpop.eup %1537  ;;  %v1000_v12 = vpop.f32.mrf.mxu0 }
 0x300   : > { %v1029_v13 = vmul.f32 %v1538_v11, %v1287_v6  ;;  %1543 = vrsqrt.f32 %v1009_v10  ;;  %v1001_v14 = vadd.f32 1e-05, %v1000_v12  ;;  %v1039_v18 = vmul.f32 %v1031_v9, %v867_v26 }
 0x301   : > { %v1540_v15 = vpop.eup %1539  ;;  %v1370_v17 = vpop.f32.mrf.mxu0 }
 0x302   : > { %v1032_v19 = vmul.f32 %v1540_v15, %v1287_v6  ;;  %1545 = vrsqrt.f32 %v1001_v14  ;;  %v1012_v1 = vadd.f32 1e-05, %v1370_v17  ;;  %v1037_v22 = vmul.f32 %v1029_v13, %v1980_v16 }
 0x303   : > { %v1542_v21 = vpop.eup %1541  ;;  %v1003_v3 = vpop.f32.mrf.mxu0  ;;  %v1054_v27 = vadd.f32 %v1288_v2, %v1039_v18 }
 0x304   : > { %v1040_v23 = vmul.f32 %v1032_v19, %v1988_v30  ;;  %v1030_v24 = vmul.f32 %v1542_v21, %v1287_v6  ;;  %v1004_v25 = vadd.f32 1e-05, %v1003_v3  ;;  %1547 = vrsqrt.f32 %v1012_v1 }
 0x305   : > { %v1052_v29 = vadd.f32 %v1288_v2, %v1037_v22 }
 0x306   : > { %v1055_v28 = vadd.f32 %v1288_v2, %v1040_v23  ;;  %v1038_v26 = vmul.f32 %v1030_v24, %v1982_v20  ;;  %1549 = vrsqrt.f32 %v1004_v25 }
 0x308   : > { %v1320_v31 = vpack.c.bf16 %v1055_v28, %v1054_v27  ;;  %v1053_v32 = vadd.f32 %v1288_v2, %v1038_v26 }
 0x30a   : > { %v1315_v33 = vpack.c.bf16 %v1053_v32, %v1052_v29  ;;  %1332 = vst [vmem:[%s367_s23 + $0x8] sm:$0xff] %v1320_v31  }
 0x30c   : > { %1316 = vst [vmem:[%s367_s23] sm:$0xff] %v1315_v33  }
 0x30d   : > { %v1544_v16 = vpop.eup %1543 }
 0x30e   : > { %v1035_v30 = vmul.f32 %v1544_v16, %v1287_v6 }
 0x30f   : > { %v1546_v34 = vpop.eup %1545 }
 0x310   : > { %v1033_v35 = vmul.f32 %v1546_v34, %v1287_v6  ;;  %v1043_v38 = vmul.f32 %v1035_v30, %v2000_v52 }
 0x311   : > { %v1548_v36 = vpop.eup %1547 }
 0x312   : > { %v1036_v40 = vmul.f32 %v1548_v36, %v1287_v6  ;;  %v1041_v20 = vmul.f32 %v1033_v35, %v1992_v39  ;;  %v1058_v45 = vadd.f32 %v1288_v2, %v1043_v38 }
 0x313   : > { %v1550_v37 = vpop.eup %1549 }
 0x314   : > { %v1034_v41 = vmul.f32 %v1550_v37, %v1287_v6  ;;  %v1044_v42 = vmul.f32 %v1036_v40, %v2002_v55  ;;  %v1056_v47 = vadd.f32 %v1288_v2, %v1041_v20 }
 0x316   : > { %v1042_v44 = vmul.f32 %v1034_v41, %v1994_v43  ;;  %v1059_v46 = vadd.f32 %v1288_v2, %v1044_v42 }
 0x318   : > { %v1057_v48 = vadd.f32 %v1288_v2, %v1042_v44  ;;  %v1330_v49 = vpack.c.bf16 %v1059_v46, %v1058_v45 }
 0x31a   : > { %v1325_v39 = vpack.c.bf16 %v1057_v48, %v1056_v47  ;;  %1334 = vst [vmem:[%s367_s23 + $0x18] sm:$0xff] %v1330_v49  }
 0x31c   : > { %1333 = vst [vmem:[%s367_s23 + $0x10] sm:$0xff] %v1325_v39  }
 0x31d   : > { %1670 = shalt.err (!%p1667_p10)
}
 0x31e   : > { %s1671_s26 = scalar_lea.hbm %s2026_s11, 512  ;;  %s1675_s15 = scalar_lea.hbm %s2079_s8, 1024 }
 0x31f   : > { %p1672_p6 = scmp.ne.s32.totalorder %s2026_s11, %s1671_s26  ;;  %p1676_p3 = scmp.lt.s32.totalorder %s2026_s11, %s2079_s8 }
 0x320   : > { %p1677_p11 = scmp.lt.s32.totalorder %s1675_s15, %s1671_s26 }
 0x321   : > { %p1673_p4 = pnand %p1672_p6, %p2104_p1 }
 0x322   : > { %p1678_p5 = por %p1677_p11, %p1676_p3 }
 0x323   : > { %p1674_p8 = pneg %p1673_p4 }
 0x325   : > { %p1679_p7 = pnand %p1678_p5, %p1674_p8 }
 0x327   : > { %1682 = shalt.err (!%p1679_p7)
}
 0x328   : > { %s1741_s20 = smov 64   ;;  %s1742_s18 = smov 4  }
 0x329   : > { %1385 = dma.vmem_to_hbm [thread:$0]  (%p2104_p1), %s2028_s3, 512, %s2026_s11, %s1101_s9, %s1741_s20, %s1741_s20, %s1742_s18  }
 0x32a PF: > { %s1129_s13 = sand.u32 1, %s1717_s27   ;;  %p2105_p12 = scmp.ne.s32.totalorder %s2089_s12, 0 }
 0x32b   : > { %p2106_p9 = scmp.ge.s32.totalorder %s1729_s30, 2  ;;  %s1130_s22 = scalar_lea.sflag [#allocation4], %s1129_s13 }
 0x32d   : > { %p1402_p13 = pnand %p2106_p9, %p2105_p12 }
 0x32f   : > { %p1403_p0 = pneg %p1402_p13 }
 0x331   : > { %1712 = dma.done.wait (%p1403_p0), %s1130_s22, 512  }
 0x332   : > { %1714 = vsyncadd (%p1403_p0), %s1130_s22, 4294966784  ;;  %p23_p2 = scmp.ge.s32.totalorder %s1874_s24, 4   ;;  %s2107_s27 = smov %s1721_s28 }
 0x333   : > { %s2108_s28 = smov %s1725_s29  ;;  %s2109_s29 = smov %s1884_s10 }
 0x334   : > { %s2110_s30 = smov %s1874_s24  ;;  %25 = sbr.rel (!%p23_p2) target bundleno = 10 (0xa), region = 109 }
 0x339   :  { %1135 = vsyncpa [#allocation3], 1 }
 0x33a   :  { %1137 = vsyncpa [#allocation3 + $0x1], 1 }
 0x33b   :  { %1138 = vsyncpa [#allocation6], 1 }
 0x33c   :  { %1139 = vsyncpa [#allocation9], 1 }
 0x33d   :  { %1140 = vsyncpa [#allocation4], 1 }
 0x33e   :  { %1142 = vsyncpa [#allocation4 + $0x1], 1 }

</bundles_post_ra>
